<compile_context>
chip_gen: v7x
topology: tpu7x:2x2x1
jax: 0.10.0
libtpu: 0.0.40
codegen_flags: <defaults>
</compile_context>

<pallas_src>
from functools import partial

import jax
import jax.numpy as jnp
from jax.experimental import pallas as pl
from jax.experimental.pallas import tpu as pltpu


def _layernorm_kernel(x_ref, g_ref, b_ref, o_ref, *, eps, inv_nm1):
    """One [block_rows, features] tile: row-wise LayerNorm with unbiased std."""
    x = x_ref[...].astype(jnp.float32)
    # Two-pass mean/variance: numerically safer than sum(x^2) - N*mean^2
    # (catastrophic cancellation for large-mean inputs), matches torch.std.
    mean = jnp.mean(x, axis=-1, keepdims=True)
    xc = x - mean
    var = jnp.sum(xc * xc, axis=-1, keepdims=True) * inv_nm1   # unbiased (N-1)
    std = jnp.sqrt(var)
    # Per-row reciprocal (tm x 1) instead of a full-width (tm x feat) divide:
    # cuts EUP work by ~feat x and turns the wide op into a VPU multiply.
    # Exact (approx=False) so the 1e-5 tolerance holds.
    inv = pl.reciprocal(std + eps, approx=False)
    y = (g_ref[...].astype(jnp.float32) * (xc * inv)
         + b_ref[...].astype(jnp.float32))
    o_ref[...] = y.astype(o_ref.dtype)


def _pick_block_rows(rows, feat, in_itemsize, vmem_budget, *, max_rows=1024):
    """Fixed sublane-aligned (multiple-of-8) row tile under the VMEM budget.

    No divisor search: the grid uses pl.cdiv, so a ragged last block is fine
    (rows are independent).  Prefers >= 4 grid steps (2 per v7x TensorCore),
    then >= 2, so double-buffering always has something to overlap with.
    """
    # Per-row VMEM cost: double-buffered x/out tiles (input dtype) plus the
    # f32 intermediates (x, xc, y) materialized after the upcast.
    per_row = max(1, feat * (4 * in_itemsize + 3 * 4))
    cap = max(8, min(vmem_budget // per_row, max_rows))
    tm = max(8, (cap // 8) * 8)
    for min_steps in (4, 2):
        limit = ((rows // min_steps) // 8) * 8
        if limit >= 8:
            tm = min(tm, limit)
            break
    # Never exceed the (sublane-padded) row count.
    tm = min(tm, ((rows + 7) // 8) * 8)
    return tm


def layernorm_forward(x, gamma, beta, *, eps=1e-6, block_rows=None):
    """Fused LayerNorm over the last axis of `x` (any leading shape)."""
    orig_shape = x.shape
    feat = int(orig_shape[-1])
    rows = 1
    for d in orig_shape[:-1]:
        rows *= int(d)

    x2 = x.reshape(rows, feat)
    g2 = gamma.reshape(1, feat).astype(jnp.float32)
    b2 = beta.reshape(1, feat).astype(jnp.float32)

    in_itemsize = jnp.dtype(x.dtype).itemsize

    # Generation-aware budget: 128 MiB parts (v5e/v6e) afford a ~48 MiB
    # working set; 64 MiB parts (v7x) get ~20 MiB so temps + headroom fit.
    try:
        vmem_capacity = int(pltpu.get_tpu_info().vmem_capacity_bytes)
    except Exception:
        vmem_capacity = 64 << 20   # conservative, v7x-sized fallback
    vmem_budget = (48 << 20) if vmem_capacity >= (128 << 20) else (20 << 20)

    if block_rows is not None:
        tm = int(block_rows)
    else:
        tm = _pick_block_rows(rows, feat, in_itemsize, vmem_budget)

    grid = (pl.cdiv(rows, tm),)   # ragged last block: extra rows masked on store

    # Explicit VMEM limit: double-buffered in/out tiles, resident gamma/beta,
    # f32 temporaries, plus headroom; never above physical VMEM minus 8 MiB.
    vmem_bytes = 4 * tm * feat * in_itemsize       # x + out, double-buffered
    vmem_bytes += 3 * tm * feat * 4                # f32 temps (x, xc, y)
    vmem_bytes += 2 * 2 * feat * 4                 # gamma + beta buffers
    vmem_limit = min(max(vmem_bytes + (2 << 20), 16 << 20),
                     vmem_capacity - (8 << 20))

    kernel = partial(_layernorm_kernel,
                     eps=float(eps),
                     inv_nm1=1.0 / float(max(feat - 1, 1)))
    # TODO(synk): feat == 1 returns beta, whereas torch.std of one element is NaN.

    out = pl.pallas_call(
        kernel,
        out_shape=jax.ShapeDtypeStruct((rows, feat), x.dtype),
        grid=grid,
        in_specs=[
            pl.BlockSpec((tm, feat), lambda i: (i, 0)),   # x: tiled over rows
            pl.BlockSpec((1, feat), lambda i: (0, 0)),    # gamma: resident
            pl.BlockSpec((1, feat), lambda i: (0, 0)),    # beta: resident
        ],
        out_specs=pl.BlockSpec((tm, feat), lambda i: (i, 0)),
        compiler_params=pltpu.CompilerParams(
            dimension_semantics=("parallel",),
            vmem_limit_bytes=int(vmem_limit),
        ),
    )(x2, g2, b2)

    return out.reshape(orig_shape)


def reference_forward(x, gamma, beta, eps):
    """Pure-JAX reference matching the PyTorch LayerNorm forward."""
    mean = jnp.mean(x, axis=-1, keepdims=True)
    std = jnp.std(x, axis=-1, keepdims=True, ddof=1)   # unbiased, like torch
    return gamma * (x - mean) / (std + eps) + beta


if __name__ == "__main__":
    key = jax.random.PRNGKey(0)
    kx, kg, kb = jax.random.split(key, 3)

    # Small but lane-dense shapes: features = 256 (multiple of 128),
    # flattened rows = 2 * 8 = 16 -> row tile 8, grid = (2,).
    B, S, D = 2, 8, 256
    eps = 1e-6

    x = jax.random.normal(kx, (B, S, D), jnp.float32)
    # Module initializes a_2 = ones, b_2 = zeros; perturb so the scale/shift
    # path is actually exercised by the check.
    gamma = 1.0 + 0.1 * jax.random.normal(kg, (D,), jnp.float32)
    beta = 0.1 * jax.random.normal(kb, (D,), jnp.float32)

    out = layernorm_forward(x, gamma, beta, eps=eps)
    out = jax.block_until_ready(out)

    ref = reference_forward(x, gamma, beta, eps)
    assert out.shape == x.shape, out.shape
    assert jnp.allclose(out, ref, atol=1e-5, rtol=1e-5), "mismatch vs reference"

    # Exercise the ragged-last-block path too (rows = 2*7 = 14, not a
    # multiple of the sublane-aligned tile).
    x_ragged = jax.random.normal(kx, (2, 7, D), jnp.float32)
    out_r = jax.block_until_ready(layernorm_forward(x_ragged, gamma, beta, eps=eps))
    ref_r = reference_forward(x_ragged, gamma, beta, eps)
    assert jnp.allclose(out_r, ref_r, atol=1e-5, rtol=1e-5), "ragged mismatch"

    print("KERNEL_OK")
</pallas_src>

<mosaic_0001>
module attributes {stable_mosaic.version = 11 : i64} {
  func.func @_layernorm_kernel(%arg0: i32, %arg1: memref<8x256xf32, #tpu.memory_space<vmem>>, %arg2: memref<1x256xf32, #tpu.memory_space<vmem>>, %arg3: memref<1x256xf32, #tpu.memory_space<vmem>>, %arg4: memref<8x256xf32, #tpu.memory_space<vmem>>) attributes {dimension_semantics = [#tpu.dimension_semantics<parallel>], iteration_bounds = array<i64: 2>, scalar_prefetch = 0 : i64, scratch_operands = 0 : i64, tpu.core_type = #tpu.core_type<tc>, window_params = [{transform_indices = @transform_0, window_bounds = array<i64: 8, 256>}, {pipeline_mode = #tpu.pipeline_mode<synchronous>, transform_indices = @transform_1, window_bounds = array<i64: 1, 256>}, {pipeline_mode = #tpu.pipeline_mode<synchronous>, transform_indices = @transform_2, window_bounds = array<i64: 1, 256>}, {transform_indices = @transform_3, window_bounds = array<i64: 8, 256>}]} {
    %c0 = arith.constant 0 : index
    %c0_0 = arith.constant 0 : index
    %0 = vector.load %arg1[%c0, %c0_0] : memref<8x256xf32, #tpu.memory_space<vmem>>, vector<8x256xf32>
    %cst = arith.constant dense<0.000000e+00> : vector<8xf32>
    %1 = vector.multi_reduction <add>, %0, %cst [1] : vector<8x256xf32> to vector<8xf32>
    %2 = vector.shape_cast %1 : vector<8xf32> to vector<8x1xf32>
    %cst_1 = arith.constant 2.560000e+02 : f32
    %3 = vector.broadcast %cst_1 : f32 to vector<8x1xf32>
    %4 = arith.divf %2, %3 : vector<8x1xf32>
    %5 = vector.broadcast %4 : vector<8x1xf32> to vector<8x256xf32>
    %6 = arith.subf %0, %5 : vector<8x256xf32>
    %7 = arith.mulf %6, %6 : vector<8x256xf32>
    %cst_2 = arith.constant dense<0.000000e+00> : vector<8xf32>
    %8 = vector.multi_reduction <add>, %7, %cst_2 [1] : vector<8x256xf32> to vector<8xf32>
    %9 = vector.shape_cast %8 : vector<8xf32> to vector<8x1xf32>
    %cst_3 = arith.constant 0.00392156886 : f32
    %10 = vector.broadcast %cst_3 : f32 to vector<8x1xf32>
    %11 = arith.mulf %9, %10 : vector<8x1xf32>
    %12 = math.sqrt %11 : vector<8x1xf32>
    %cst_4 = arith.constant 9.99999997E-7 : f32
    %13 = vector.broadcast %cst_4 : f32 to vector<8x1xf32>
    %14 = arith.addf %12, %13 : vector<8x1xf32>
    %15 = tpu.reciprocal %14 : vector<8x1xf32> -> vector<8x1xf32>
    %c0_5 = arith.constant 0 : index
    %c0_6 = arith.constant 0 : index
    %16 = vector.load %arg2[%c0_5, %c0_6] : memref<1x256xf32, #tpu.memory_space<vmem>>, vector<1x256xf32>
    %17 = vector.broadcast %15 : vector<8x1xf32> to vector<8x256xf32>
    %18 = arith.mulf %6, %17 : vector<8x256xf32>
    %19 = vector.broadcast %16 : vector<1x256xf32> to vector<8x256xf32>
    %20 = arith.mulf %19, %18 : vector<8x256xf32>
    %c0_7 = arith.constant 0 : index
    %c0_8 = arith.constant 0 : index
    %21 = vector.load %arg3[%c0_7, %c0_8] : memref<1x256xf32, #tpu.memory_space<vmem>>, vector<1x256xf32>
    %22 = vector.broadcast %21 : vector<1x256xf32> to vector<8x256xf32>
    %23 = arith.addf %20, %22 : vector<8x256xf32>
    %c0_9 = arith.constant 0 : index
    %c0_10 = arith.constant 0 : index
    %24 = vector.load %arg4[%c0_9, %c0_10] : memref<8x256xf32, #tpu.memory_space<vmem>>, vector<8x256xf32>
    tpu.vector_store %arg4[%c0_9, %c0_10], %23 {strides = array<i32>} : memref<8x256xf32, #tpu.memory_space<vmem>>, vector<8x256xf32>,
    return
  }
  func.func @transform_0(%arg0: i32) -> (i32, i32) {
    %c0_i32 = arith.constant 0 : i32
    %c0_i32_0 = arith.constant 0 : i32
    return %arg0, %c0_i32 : i32, i32
  }
  func.func @transform_1(%arg0: i32) -> (i32, i32) {
    %c0_i32 = arith.constant 0 : i32
    %c0_i32_0 = arith.constant 0 : i32
    %c0_i32_1 = arith.constant 0 : i32
    return %c0_i32, %c0_i32_0 : i32, i32
  }
  func.func @transform_2(%arg0: i32) -> (i32, i32) {
    %c0_i32 = arith.constant 0 : i32
    %c0_i32_0 = arith.constant 0 : i32
    %c0_i32_1 = arith.constant 0 : i32
    return %c0_i32, %c0_i32_0 : i32, i32
  }
  func.func @transform_3(%arg0: i32) -> (i32, i32) {
    %c0_i32 = arith.constant 0 : i32
    %c0_i32_0 = arith.constant 0 : i32
    return %arg0, %c0_i32 : i32, i32
  }
}

</mosaic_0001>

<bundles_post_ra>
// kernel: tpu_custom_call.1
= control target key start
LH: loop header
LB: loop body
LE: loop exit
PB: predicated region body
PF: predicated region fallthrough
CT: control target
= control target key end

     0   :  { %8 = vsyncpa [#allocation3], 0  ;;  %s685_s0 = inlined_call_operand.hbm [shape: f32[16,256], index: 0, kind: input, shape index: {}]   ;;  %s686_s1 = inlined_call_operand.vmem [shape: f32[1,256], index: 1, kind: input, shape index: {}]   ;;  %s687_s2 = inlined_call_operand.vmem [shape: f32[1,256], index: 2, kind: input, shape index: {}]   ;;  %s688_s3 = inlined_call_operand.hbm [shape: f32[16,256], index: 3, kind: output, shape index: {}]  }
   0x1   :  { %10 = vsyncpa [#allocation3 + $0x1], 0 }
   0x2   :  { %11 = vsyncpa [#allocation4], 0 }
   0x3   :  { %13 = vsyncpa [#allocation4 + $0x1], 0  ;;  %s514_s12 = smov 0   ;;  %s516_s13 = smov 0  }
   0x4   :  { %s518_s14 = smov 0   ;;  %s520_s15 = smov 0  }
   0x5 LB: > { %s535_s16 = sadd.s32 4294967295, %s490_s15   ;;  %s328_s17 = sadd.s32 4294967294, %s490_s15   ;;  %s490_s15 = sphi %s520_s15, %s703_s15   ;;  %s486_s14 = sphi %s518_s14, %s702_s14   ;;  %s482_s13 = sphi %s516_s13, %s701_s13   ;;  %s478_s12 = sphi %s514_s12, %s700_s12  }
   0x6   : > { %s539_s18 = sadd.s32 1, %s490_s15   ;;  %s26_s19 = sadd.s32 1, %s486_s14 }
   0x7   : > { %s23_s20 = ssub.s32 %s490_s15, %s539_s18  ;;  %p33_p0 = scmp.ne.s32.totalorder %s486_s14, %s482_s13 }
   0x8   : > { %p24_p1 = scmp.eq.s32.totalorder %s23_s20, 0  ;;  %p34_p2 = scmp.eq.s32.totalorder %s490_s15, 0 }
   0x9   : > { %p39_p3 = scmp.ne.s32.totalorder %s482_s13, %s478_s12  ;;  %p40_p4 = scmp.eq.s32.totalorder %s535_s16, 0 }
   0xa   : > { %s551_s21 = scalar_select %p24_p1, %s486_s14, %s26_s19  }
   0xb   : > { %p553_p5 = por %p34_p2, %p33_p0  ;;  %p557_p6 = por %p40_p4, %p39_p3 }
   0xc   : > { %p105_p7 = scmp.eq.s32.totalorder %s535_s16, 1  ;;  %p111_p8 = scmp.eq.s32.totalorder %s328_s17, 1 }
   0xd   : > { %p356_p10 = scmp.lt.s32.totalorder %s490_s15, 2  ;;  %s137_s26 = sand.u32 1, %s486_s14  }
   0xe   : > { %p564_p11 = por %p105_p7, %p33_p0  ;;  %p568_p12 = por %p111_p8, %p39_p3 }
   0xf   : > { %s342_s27 = sshll.u32 %s490_s15, 8  ;;  %s331_s28 = sshll.u32 %s137_s26, 4 }
  0x10   : > { %s692_s24 = scalar_select %p564_p11, 1, 0 }
  0x11   : > { %s693_s25 = scalar_select %p568_p12, 1, 0 }
  0x12   : > { %s577_s4 = scalar_lea.hbm %s685_s0, %s342_s27  ;;  %s141_s5 = scalar_lea.vmem [#allocation2], %s331_s28 }
  0x13   : > { %s149_s6 = sshll.u32 %s141_s5, 4  ;;  %p581_p13 = pnand %p356_p10, %p553_p5  ;;  %s585_s6 = int_to_ptr.vmem [resolvable:$true] %s149_s6 }
  0x14   : > { %s138_s8 = scalar_lea.sflag [#allocation3], %s137_s26  ;;  %s394_s9 = scalar_lea.hbm %s577_s4, 256 }
  0x15   : > { %p395_p2 = scmp.ne.s32.totalorder %s577_s4, %s394_s9  ;;  %p396_p3 = pneg %p581_p13 }
  0x16   : > { %s399_s17 = scalar_lea.hbm %s685_s0, 512  ;;  %p400_p5 = scmp.lt.u32.totalorder %s577_s4, %s685_s0 }
  0x17   : > { %p397_p4 = pnand %p396_p3, %p395_p2  ;;  %p401_p8 = scmp.lt.u32.totalorder %s399_s17, %s394_s9 }
  0x18   : > { %p403_p9 = scmp.lt.u32.totalorder %s394_s9, %s577_s4 }
  0x19   : > { %p398_p7 = pneg %p397_p4  ;;  %p402_p10 = por %p401_p8, %p400_p5 }
  0x1b   : > { %p404_p0 = por %p403_p9, %p402_p10 }
  0x1d   : > { %p405_p1 = pnand %p404_p0, %p398_p7 }
  0x1f   : > { %408 = shalt.err (!%p405_p1)
}
  0x20   : > { %s409_s22 = scalar_lea.vmem %s585_s6, 256  ;;  %s492_s26 = smov [#allocation2]  }
  0x21   : > { %p410_p2 = scmp.ne.s32.totalorder %s585_s6, %s409_s22  ;;  %s414_s27 = sshll.u32 %s492_s26, 4  ;;  %s415_s27 = int_to_ptr.vmem [resolvable:$false] %s414_s27 }
  0x22   : > { %s416_s28 = scalar_lea.vmem %s415_s27, 512  ;;  %p417_p11 = scmp.lt.s32.totalorder %s585_s6, %s415_s27 }
  0x23   : > { %p412_p4 = pnand %p410_p2, %p396_p3  ;;  %p418_p5 = scmp.lt.s32.totalorder %s416_s28, %s409_s22 }
  0x25   : > { %p413_p12 = pneg %p412_p4  ;;  %p419_p8 = por %p418_p5, %p417_p11 }
  0x27   : > { %p420_p9 = pnand %p419_p8, %p413_p12 }
  0x29   : > { %423 = shalt.err (!%p420_p9)
}
  0x2a   : > { %351 = dma.hbm_to_vmem [thread:$0]  (!%p581_p13), %s577_s4, 256, %s585_s6, %s138_s8  }
  0x2b   : > { %p695_p0 = scmp.lt.s32.totalorder %s490_s15, 3  ;;  %p696_p1 = scmp.ge.s32.totalorder %s490_s15, 1 }
  0x2d   : > { %p155_p3 = pnand %p696_p1, %p695_p0 }
  0x2e   : > { %s619_s29 = sand.u32 (!%p155_p3), 1, %s482_s13  }
  0x2f   : > { %158 = sbr.rel (%p155_p3) target bundleno = 400 (0x190), region = 32  ;;  %s335_s30 = sshll.u32 (!%p155_p3), %s619_s29, 4 }
  0x30   : > { %s161_s5 = scalar_lea.sflag (!%p155_p3), [#allocation3], %s619_s29  ;;  %s164_s7 = scalar_lea.vmem (!%p155_p3), [#allocation2], %s335_s30 }
  0x36   : > { %469 = dma.done.wait (%p557_p6), %s161_s5, 256  }
  0x37   : > { %471 = vsyncadd (%p557_p6), %s161_s5, 4294967040  ;;  %v187_v0 = vld [vmem:[%s164_s7] sm:$0xff]  ;;  %v188_v1 = vld [vmem:[%s164_s7 + $0x8] sm:$0xff]  ;;  %v215_v17 = vlaneseq  ;;  %s343_s9 = sshll.u32 %s535_s16, 8  ;;  %s186_s10 = scalar_lea.vmem [#allocation5], %s335_s30 }
  0x38   : > { %v189_v2 = vadd.f32 %v188_v1, %v187_v0  ;;  %v211_v22 = vld [vmem:[%s686_s1] sm:$0x3]  ;;  %s258_s11 = sshll.u32 %s186_s10, 4  ;;  %s641_s20 = scalar_lea.hbm %s688_s3, %s343_s9  ;;  %s643_s11 = int_to_ptr.vmem [resolvable:$true] %s258_s11 }
  0x39   : > { %v216_v19 = vshrl.u32 %v215_v17, 7  ;;  %v227_v23 = vld [vmem:[%s687_s2] sm:$0x3]  ;;  %s244_s16 = scalar_lea.sflag [#allocation4], %s619_s29  ;;  %s424_s22 = scalar_lea.vmem %s643_s11, 256 }
  0x3a   : > { %190 = vadd.xlane.f32.xlu0 %v189_v2  ;;  %p425_p6 = scmp.ne.s32.totalorder %s643_s11, %s424_s22  ;;  %p697_p11 = scmp.ne.s32.totalorder %s692_s24, 0 }
  0x3b   : > { %v217_v20 = vsub.s32 0, %v216_v19  ;;  %v221_v21 = vsub.s32 1, %v216_v19  ;;  %s493_s26 = smov [#allocation5]  }
  0x3c   : > { %p426_p12 = pnand %p425_p6, %p697_p11  ;;  %s428_s27 = sshll.u32 %s493_s26, 4  ;;  %s429_s27 = int_to_ptr.vmem [resolvable:$false] %s428_s27 }
  0x3d   : > { %v218_v24 = vrot.slane %v211_v22, %v217_v20  ;;  %v222_v25 = vrot.slane %v211_v22, %v221_v21  ;;  %v232_v29 = vrot.slane %v227_v23, %v217_v20  ;;  %v236_v30 = vrot.slane %v227_v23, %v221_v21  ;;  %s430_s28 = scalar_lea.vmem %s429_s27, 512  ;;  %p431_p7 = scmp.lt.s32.totalorder %s643_s11, %s429_s27 }
  0x3e   : > { %p427_p13 = pneg %p426_p12  ;;  %p432_p10 = scmp.lt.s32.totalorder %s430_s28, %s424_s22 }
  0x40   : > { %p433_p2 = por %p432_p10, %p431_p7 }
  0x42   : > { %p434_p4 = pnand %p433_p2, %p427_p13 }
  0xc7   : > { %v191_v3 = vpop.xlane.xlu0 %190 }
  0xc8   : > { %v193_v4 = vmul.f32 0.00390625, %v191_v3 }
  0xca   : > { %v194_v5 = vsub.f32 %v187_v0, %v193_v4  ;;  %v195_v6 = vsub.f32 %v188_v1, %v193_v4 }
  0xcc   : > { %v196_v7 = vmul.f32 %v194_v5, %v194_v5  ;;  %v197_v8 = vmul.f32 %v195_v6, %v195_v6 }
  0xce   : > { %v198_v9 = vadd.f32 %v197_v8, %v196_v7 }
  0xd0   : > { %199 = vadd.xlane.f32.xlu0 %v198_v9 }
 0x15d   : > { %v200_v10 = vpop.xlane.xlu0 %199 }
 0x15e   : > { %v201_v11 = vmul.f32 0.003921569, %v200_v10 }
 0x160   : > { %390 = vrsqrt.f32 %v201_v11  ;;  %vm204_vm0 = vcmp.eq.f32.partialorder %v201_v11, inf  ;;  %v207_v14 = vand.u32 2147483648, %v201_v11  ;;  %vm206_vm1 = vcmp.eq.f32.partialorder %v201_v11, 0.0 }
 0x16a   : > { %v391_v12 = vpop.eup %390 }
 0x16b   : > { %v203_v13 = vmul.f32 %v391_v12, %v201_v11 }
 0x16d   : > { %v205_v15 = vsel %vm204_vm0, %v201_v11, %v203_v13 }
 0x16e   : > { %v208_v16 = vsel %vm206_vm1, %v207_v14, %v205_v15 }
 0x16f   : > { %v209_v18 = vadd.f32 1e-06, %v208_v16 }
 0x171   : > { %392 = vrcp.f32 %v209_v18 }
 0x17b   : > { %v393_v26 = vpop.eup %392 }
 0x17c   : > { %v212_v27 = vmul.f32 %v393_v26, %v194_v5  ;;  %v213_v28 = vmul.f32 %v393_v26, %v195_v6 }
 0x17e   : > { %v225_v31 = vmul.f32 %v218_v24, %v212_v27  ;;  %v226_v32 = vmul.f32 %v222_v25, %v213_v28 }
 0x180   : > { %v239_v33 = vadd.f32 %v232_v29, %v225_v31  ;;  %v240_v34 = vadd.f32 %v236_v30, %v226_v32 }
 0x182   : > { %241 = vst [vmem:[%s186_s10] sm:$0xff] %v239_v33  ;;  %242 = vst [vmem:[%s186_s10 + $0x8] sm:$0xff] %v240_v34 }
 0x183   : > { %437 = shalt.err (!%p434_p4)
}
 0x184   : > { %s438_s29 = scalar_lea.hbm %s641_s20, 256  ;;  %s442_s7 = scalar_lea.hbm %s688_s3, 512 }
 0x185   : > { %p439_p5 = scmp.ne.s32.totalorder %s641_s20, %s438_s29  ;;  %p443_p0 = scmp.lt.u32.totalorder %s641_s20, %s688_s3 }
 0x186   : > { %p444_p1 = scmp.lt.u32.totalorder %s442_s7, %s438_s29  ;;  %p446_p6 = scmp.lt.u32.totalorder %s438_s29, %s641_s20 }
 0x187   : > { %p440_p8 = pnand %p439_p5, %p697_p11 }
 0x188   : > { %p445_p3 = por %p444_p1, %p443_p0 }
 0x189   : > { %p441_p9 = pneg %p440_p8 }
 0x18a   : > { %p447_p12 = por %p446_p6, %p445_p3 }
 0x18c   : > { %p448_p13 = pnand %p447_p12, %p441_p9 }
 0x18e   : > { %451 = shalt.err (!%p448_p13)
}
 0x18f   : > { %346 = dma.vmem_to_hbm [thread:$0]  (%p697_p11), %s643_s11, 256, %s641_s20, %s244_s16  }
 0x190 PF: > { %s270_s6 = sand.u32 1, %s478_s12   ;;  %p698_p7 = scmp.ne.s32.totalorder %s693_s25, 0 }
 0x191   : > { %p699_p10 = scmp.ge.s32.totalorder %s490_s15, 2  ;;  %s271_s8 = scalar_lea.sflag [#allocation4], %s270_s6 }
 0x193   : > { %p353_p2 = pnand %p699_p10, %p698_p7 }
 0x195   : > { %473 = dma.done.wait (!%p353_p2), %s271_s8, 256  }
 0x196   : > { %475 = vsyncadd (!%p353_p2), %s271_s8, 4294967040  ;;  %p16_p4 = scmp.ge.s32.totalorder %s539_s18, 4   ;;  %s700_s12 = smov %s482_s13 }
 0x197   : > { %s701_s13 = smov %s486_s14  ;;  %s702_s14 = smov %s551_s21 }
 0x198   : > { %s703_s15 = smov %s539_s18  ;;  %18 = sbr.rel (!%p16_p4) target bundleno = 5 (0x5), region = 77 }
 0x19f   :  { %276 = vsyncpa [#allocation3], 1 }
 0x1a0   :  { %278 = vsyncpa [#allocation3 + $0x1], 1 }
 0x1a1   :  { %279 = vsyncpa [#allocation4], 1 }
 0x1a2   :  { %281 = vsyncpa [#allocation4 + $0x1], 1 }

</bundles_post_ra>
